<compile_context>
chip_gen: v7x
topology: tpu7x:2x2x1
jax: 0.10.0
libtpu: 0.0.40
codegen_flags: <defaults>
</compile_context>

<pallas_src>
import functools

import numpy as np
import jax
import jax.numpy as jnp
from jax import lax
from jax.experimental import pallas as pl
from jax.experimental.pallas import tpu as pltpu


def _round_up(x, m):
    return ((x + m - 1) // m) * m


def attribute_kernel(sig_ref, x_ref, out_ref, *, n_valid):
    s = sig_ref[...]          # (Np, Dp)      bf16, resident across the T grid
    x = x_ref[...]            # (TILE_T, Dp)  bf16, streamed per grid step
    # scores = signatures @ inputs.T  -> (Np, TILE_T); bf16 MXU operands, f32 accumulate.
    scores = lax.dot_general(
        s, x, (((1,), (1,)), ((), ())), preferred_element_type=jnp.float32
    )
    # Padded assembly rows (zero signatures -> score 0) must not leak into the softmax sum.
    # Static check: no masking code is emitted when N is already sublane-aligned.
    if n_valid != scores.shape[0]:
        row = lax.broadcasted_iota(jnp.int32, scores.shape, 0)
        scores = jnp.where(row < n_valid, scores, jnp.float32(-1e30))
    # Numerically stable log_softmax over axis 0 (assembly axis), f32 epilogue.
    m = jnp.max(scores, axis=0, keepdims=True)                          # (1, TILE_T)
    lse = jnp.log(jnp.sum(jnp.exp(scores - m), axis=0, keepdims=True))  # (1, TILE_T)
    # Fold the two broadcasts into a single subtraction pass.
    out_ref[...] = scores - (m + lse)
    # TODO(synk): for very large N (> ~512 assemblies) tile N with an online-softmax
    # accumulation over an "arbitrary" N grid axis; a single resident N tile is optimal here.


def attribute_forward(signatures, inputs, *, tile_t=256):
    """signatures: (N, D) f32, inputs: (T, D) f32 -> (N, T) f32 log-probs over axis 0."""
    N, D = signatures.shape
    T, D2 = inputs.shape
    assert D == D2, "feature dims must match"

    # Align: N -> sublane (8), D (contraction) and T (output lane) -> lane (128).
    Np = _round_up(max(N, 1), 8)
    Dp = _round_up(max(D, 1), 128)
    tile_t = max(128, _round_up(min(tile_t, max(T, 1)), 128))
    Tp = _round_up(max(T, 1), tile_t)

    # Zero-pad both operands (zeros contribute 0 to the dot); cast to bf16 for the MXU.
    # Skip the pad pass entirely when shapes are already aligned (pure layout plumbing).
    sig_bf = signatures.astype(jnp.bfloat16)
    if (Np, Dp) != (N, D):
        sig_p = jnp.zeros((Np, Dp), jnp.bfloat16).at[:N, :D].set(sig_bf)
    else:
        sig_p = sig_bf
    x_bf = inputs.astype(jnp.bfloat16)
    if (Tp, Dp) != (T, D):
        x_p = jnp.zeros((Tp, Dp), jnp.bfloat16).at[:T, :D].set(x_bf)
    else:
        x_p = x_bf

    grid = (Tp // tile_t,)

    # VMEM budget (double-buffered): resident signatures + input tile + output tile.
    # v7x has 64 MiB physical / 32 MiB default scoped VMEM per TensorCore.
    vmem_need = 2 * (Np * Dp * 2) + 2 * (tile_t * Dp * 2) + 2 * (Np * tile_t * 4)
    assert vmem_need < (32 << 20), "tile footprint exceeds v7x scoped VMEM; reduce tile_t"

    kernel = functools.partial(attribute_kernel, n_valid=N)

    out_p = pl.pallas_call(
        kernel,
        out_shape=jax.ShapeDtypeStruct((Np, Tp), jnp.float32),
        grid=grid,
        in_specs=[
            pl.BlockSpec((Np, Dp), lambda t: (0, 0)),        # signatures stay resident
            pl.BlockSpec((tile_t, Dp), lambda t: (t, 0)),    # stream T tiles (pipelined)
        ],
        out_specs=pl.BlockSpec((Np, tile_t), lambda t: (0, t)),
        compiler_params=pltpu.CompilerParams(
            dimension_semantics=("parallel",),               # megacore split over T tiles (v7x)
            vmem_limit_bytes=32 << 20,
        ),
    )(sig_p, x_p)

    # Slice away the padded assembly rows and T columns.
    return out_p[:N, :T]


def make_signatures(attribute_labels):
    """Mirror of AttributeModel._make_signatures (F.one_hot -> reshape -> 2x-1)."""
    labels = np.asarray(attribute_labels, dtype=np.int64)
    num_classes = int(labels.max()) + 1  # F.one_hot default
    onehot = jax.nn.one_hot(jnp.asarray(labels, dtype=jnp.int32),
                            num_classes, dtype=jnp.float32)
    onehot = onehot.reshape(labels.shape[0], -1)
    return 2.0 * onehot - 1.0


def build_attribute_model(*attribute_label_groups):
    """Mirror of AttributeModel.__init__: concat per-group signatures along dim=1."""
    sigs = [make_signatures(labels) for labels in attribute_label_groups]
    return jnp.concatenate(sigs, axis=1)


if __name__ == "__main__":
    # Deterministic parameter setup: two attribute groups, N=8 assemblies, D=7 features.
    group1 = [0, 1, 2, 3, 0, 1, 2, 3]   # 4 classes
    group2 = [0, 1, 2, 0, 1, 2, 0, 1]   # 3 classes
    signatures = build_attribute_model(group1, group2)   # (8, 7), entries exactly +/-1
    N, D = signatures.shape

    # Inputs: (T, D) attribute scores per sample (PyTorch forward transposes internally).
    T = 8
    key = jax.random.PRNGKey(0)
    inputs = jax.random.normal(key, (T, D), dtype=jnp.float32)

    out = attribute_forward(signatures, inputs)
    out = jax.block_until_ready(out)
    assert out.shape == (N, T)

    # Tight cross-check: reference with the same bf16 operand rounding (signatures are
    # exactly +/-1, so only the inputs are rounded), f32 accumulation.
    inp_bf = inputs.astype(jnp.bfloat16).astype(jnp.float32)
    ref_bf = jax.nn.log_softmax(signatures @ inp_bf.T, axis=0)
    np.testing.assert_allclose(np.asarray(out), np.asarray(ref_bf), atol=1e-4, rtol=1e-4)

    # Semantic check against the full-f32 PyTorch-equivalent forward (bf16 rounding tolerance).
    ref_f32 = jax.nn.log_softmax(signatures @ inputs.T, axis=0)
    np.testing.assert_allclose(np.asarray(out), np.asarray(ref_f32), atol=5e-2, rtol=5e-2)

    # Non-aligned-N path exercise (masking branch): N=5 assemblies, padded to 8 in-kernel.
    sig5 = signatures[:5]
    out5 = jax.block_until_ready(attribute_forward(sig5, inputs))
    ref5 = jax.nn.log_softmax(sig5 @ inp_bf.T, axis=0)
    np.testing.assert_allclose(np.asarray(out5), np.asarray(ref5), atol=1e-4, rtol=1e-4)

    # predict() equivalent (argmax over assembly axis) — plain JAX glue.
    _ = jnp.argmax(out, axis=0)

    print("KERNEL_OK")
</pallas_src>

<mosaic_0001>
module attributes {stable_mosaic.version = 11 : i64} {
  func.func @attribute_kernel(%arg0: i32, %arg1: memref<8x128xbf16, #tpu.memory_space<vmem>>, %arg2: memref<128x128xbf16, #tpu.memory_space<vmem>>, %arg3: memref<8x128xf32, #tpu.memory_space<vmem>>) attributes {dimension_semantics = [#tpu.dimension_semantics<parallel>], iteration_bounds = array<i64: 1>, scalar_prefetch = 0 : i64, scratch_operands = 0 : i64, tpu.core_type = #tpu.core_type<tc>, window_params = [{pipeline_mode = #tpu.pipeline_mode<synchronous>, transform_indices = @transform_0, window_bounds = array<i64: 8, 128>}, {transform_indices = @transform_1, window_bounds = array<i64: 128, 128>}, {transform_indices = @transform_2, window_bounds = array<i64: 8, 128>}]} {
    %c0 = arith.constant 0 : index
    %c0_0 = arith.constant 0 : index
    %0 = vector.load %arg1[%c0, %c0_0] : memref<8x128xbf16, #tpu.memory_space<vmem>>, vector<8x128xbf16>
    %c0_1 = arith.constant 0 : index
    %c0_2 = arith.constant 0 : index
    %1 = vector.load %arg2[%c0_1, %c0_2] : memref<128x128xbf16, #tpu.memory_space<vmem>>, vector<128x128xbf16>
    %cst = arith.constant dense<0.000000e+00> : vector<8x128xf32>
    %2 = tpu.matmul %0, %1, %cst {dimension_numbers = #tpu.dot_dimension_numbers<[1], [1], [0], [0], [0, 0, 1, 0], [], []>} : vector<8x128xbf16>, vector<128x128xbf16>, vector<8x128xf32> -> vector<8x128xf32>
    %cst_3 = arith.constant dense<0xFF800000> : vector<128xf32>
    %3 = vector.multi_reduction <maximumf>, %2, %cst_3 [0] : vector<8x128xf32> to vector<128xf32>
    %4 = vector.shape_cast %3 : vector<128xf32> to vector<1x128xf32>
    %5 = vector.broadcast %4 : vector<1x128xf32> to vector<8x128xf32>
    %6 = arith.subf %2, %5 : vector<8x128xf32>
    %7 = math.exp %6 : vector<8x128xf32>
    %cst_4 = arith.constant dense<0.000000e+00> : vector<128xf32>
    %8 = vector.multi_reduction <add>, %7, %cst_4 [0] : vector<8x128xf32> to vector<128xf32>
    %9 = vector.shape_cast %8 : vector<128xf32> to vector<1x128xf32>
    %10 = math.log %9 : vector<1x128xf32>
    %11 = arith.addf %4, %10 : vector<1x128xf32>
    %12 = vector.broadcast %11 : vector<1x128xf32> to vector<8x128xf32>
    %13 = arith.subf %2, %12 : vector<8x128xf32>
    %c0_5 = arith.constant 0 : index
    %c0_6 = arith.constant 0 : index
    %14 = vector.load %arg3[%c0_5, %c0_6] : memref<8x128xf32, #tpu.memory_space<vmem>>, vector<8x128xf32>
    tpu.vector_store %arg3[%c0_5, %c0_6], %13 {strides = array<i32>} : memref<8x128xf32, #tpu.memory_space<vmem>>, vector<8x128xf32>,
    return
  }
  func.func @transform_0(%arg0: i32) -> (i32, i32) {
    %c0_i32 = arith.constant 0 : i32
    %c0_i32_0 = arith.constant 0 : i32
    %c0_i32_1 = arith.constant 0 : i32
    return %c0_i32, %c0_i32_0 : i32, i32
  }
  func.func @transform_1(%arg0: i32) -> (i32, i32) {
    %c0_i32 = arith.constant 0 : i32
    %c0_i32_0 = arith.constant 0 : i32
    return %arg0, %c0_i32 : i32, i32
  }
  func.func @transform_2(%arg0: i32) -> (i32, i32) {
    %c0_i32 = arith.constant 0 : i32
    %c0_i32_0 = arith.constant 0 : i32
    return %c0_i32, %arg0 : i32, i32
  }
}

</mosaic_0001>

<bundles_post_ra>
// kernel: tpu_custom_call.1
= control target key start
LH: loop header
LB: loop body
LE: loop exit
PB: predicated region body
PF: predicated region fallthrough
CT: control target
= control target key end

     0   :  { %7 = vsyncpa [#allocation3], 0  ;;  %s373_s0 = inlined_call_operand.hbm [shape: bf16[8,128], index: 0, kind: input, shape index: {}]   ;;  %s374_s1 = inlined_call_operand.hbm [shape: bf16[128,128], index: 1, kind: input, shape index: {}]   ;;  %s375_s2 = inlined_call_operand.hbm [shape: f32[8,128], index: 2, kind: output, shape index: {}]  }
   0x1   :  { %8 = vsyncpa [#allocation6], 0 }
   0x2   :  { %9 = vsyncpa [#allocation4], 0  ;;  %s308_s9 = smov [#allocation2]   ;;  %s309_s11 = smov [#allocation5]  }
   0x3   :  { %s16_s10 = sshll.u32 %s308_s9, 4  ;;  %s25_s12 = sshll.u32 %s309_s11, 4  ;;  %s17_s10 = int_to_ptr.vmem [resolvable:$true] %s16_s10  ;;  %s330_s12 = int_to_ptr.vmem [resolvable:$true] %s25_s12 }
   0x4   :  { %s236_s15 = scalar_lea.hbm %s373_s0, 64 }
   0x5   :  { %p237_p0 = scmp.ne.s32.totalorder %s373_s0, %s236_s15  ;;  %p240_p1 = scmp.lt.u32.totalorder %s236_s15, %s373_s0 }
   0x7   :  { %p242_p2 = pnand %p240_p1, %p237_p0 }
   0x9   :  { %245 = shalt.err (!%p242_p2)
}
   0xa   :  { %s246_s20 = scalar_lea.vmem %s17_s10, 64  ;;  %p251_p4 = scmp.lt.s32.totalorder %s17_s10, %s17_s10 }
   0xb   :  { %p247_p3 = scmp.ne.s32.totalorder %s17_s10, %s246_s20  ;;  %p252_p5 = scmp.lt.s32.totalorder %s246_s20, %s246_s20 }
   0xd   :  { %p253_p6 = por %p252_p5, %p251_p4 }
   0xf   :  { %p254_p7 = pnand %p253_p6, %p247_p3 }
  0x11   :  { %257 = shalt.err (!%p254_p7)
}
  0x12   :  { %19 = dma.hbm_to_vmem [thread:$0]  %s373_s0, 64, %s17_s10, [#allocation3]  }
  0x13   :  { %s258_s25 = scalar_lea.hbm %s374_s1, 1024 }
  0x14   :  { %p259_p8 = scmp.ne.s32.totalorder %s374_s1, %s258_s25  ;;  %p262_p9 = scmp.lt.u32.totalorder %s258_s25, %s374_s1 }
  0x16   :  { %p264_p10 = pnand %p262_p9, %p259_p8 }
  0x18   :  { %267 = shalt.err (!%p264_p10)
}
  0x19   :  { %s268_s30 = scalar_lea.vmem %s330_s12, 1024  ;;  %p273_p12 = scmp.lt.s32.totalorder %s330_s12, %s330_s12 }
  0x1a   :  { %p269_p11 = scmp.ne.s32.totalorder %s330_s12, %s268_s30  ;;  %p274_p13 = scmp.lt.s32.totalorder %s268_s30, %s268_s30 }
  0x1c   :  { %p275_p0 = por %p274_p13, %p273_p12 }
  0x1e   :  { %p276_p1 = pnand %p275_p0, %p269_p11 }
  0x20   :  { %279 = shalt.err (!%p276_p1)
}
  0x21   :  { %s310_s0 = smov 64   ;;  %s311_s3 = smov 4  }
  0x22   :  { %31 = dma.hbm_to_vmem [thread:$0]  %s374_s1, 1024, %s330_s12, [#allocation6], %s310_s0, %s310_s0, %s311_s3  }
  0x23   :  { %302 = dma.done.wait [#allocation3], 64  }
  0x24   :  { %303 = vsyncadd [#allocation3], 4294967232 }
  0x25   :  { %304 = dma.done.wait [#allocation6], 1024  }
  0x26   :  { %305 = vsyncadd [#allocation6], 4294966272  ;;  %v312_v0 = vmov 0.0   ;;  %vm313_vm0 = vmmov 0   ;;  %v224_v1 = vld [vmem:[#allocation5] sm:$0xff]   ;;  %v225_v2 = vld [vmem:[#allocation5 + $0x8] sm:$0xff]  }
  0x27   :  { %197 = vmatprep.subr.bf16.mxu0 %v312_v0  ;;  %213 = vmatprep.mubr.msk.bf16.mxu0 %vm313_vm0, %v312_v0  ;;  %v226_v3 = vld [vmem:[#allocation5 + $0x10] sm:$0xff]   ;;  %v227_v4 = vld [vmem:[#allocation5 + $0x18] sm:$0xff]   ;;  %v228_v5 = vld [vmem:[#allocation5 + $0x20] sm:$0xff]   ;;  %s314_s1 = smov [#allocation7]  }
  0x28   :  { %198 = vmatpush3.bf16.xpose.msra.mxu0 %v224_v1  ;;  %v229_v6 = vld [vmem:[#allocation5 + $0x28] sm:$0xff]   ;;  %v230_v7 = vld [vmem:[#allocation5 + $0x30] sm:$0xff]   ;;  %v231_v8 = vld [vmem:[#allocation5 + $0x38] sm:$0xff]   ;;  %s170_s6 = sshll.u32 %s314_s1, 4  ;;  %s171_s6 = int_to_ptr.vmem [resolvable:$true] %s170_s6 }
  0x29   :  { %199 = vmatprep.subr.bf16.mxu0 %v312_v0  ;;  %v39_v9 = vld [vmem:[#allocation2] sm:$0xf]  ;;  %s280_s7 = scalar_lea.vmem %s171_s6, 128  ;;  %p285_p3 = scmp.lt.s32.totalorder %s171_s6, %s171_s6 }
  0x2a   :  { %p281_p2 = scmp.ne.s32.totalorder %s171_s6, %s280_s7  ;;  %p286_p4 = scmp.lt.s32.totalorder %s280_s7, %s280_s7 }
  0x2c   :  { %p287_p5 = por %p286_p4, %p285_p3 }
  0x2e   :  { %p288_p6 = pnand %p287_p5, %p281_p2 }
  0x30   :  { %200 = vmatpush3.bf16.xpose.msra.mxu0 %v225_v2 }
  0x31   :  { %201 = vmatprep.subr.bf16.mxu0 %v312_v0 }
  0x38   :  { %202 = vmatpush3.bf16.xpose.msra.mxu0 %v226_v3 }
  0x39   :  { %203 = vmatprep.subr.bf16.mxu0 %v312_v0 }
  0x40   :  { %204 = vmatpush3.bf16.xpose.msra.mxu0 %v227_v4 }
  0x41   :  { %205 = vmatprep.subr.bf16.mxu0 %v312_v0 }
  0x48   :  { %206 = vmatpush3.bf16.xpose.msra.mxu0 %v228_v5 }
  0x49   :  { %207 = vmatprep.subr.bf16.mxu0 %v312_v0 }
  0x50   :  { %208 = vmatpush3.bf16.xpose.msra.mxu0 %v229_v6 }
  0x51   :  { %209 = vmatprep.subr.bf16.mxu0 %v312_v0 }
  0x58   :  { %210 = vmatpush3.bf16.xpose.msra.mxu0 %v230_v7 }
  0x59   :  { %211 = vmatprep.subr.bf16.mxu0 %v312_v0 }
  0x60   :  { %212 = vmatpush3.bf16.xpose.msra.mxu0 %v231_v8 }
  0x67   :  { %214 = vmatmul.mubr.bf16.vlgmr.msra.gmra.mrb[0].mxu0 %v39_v9 }
 0x13a   :  { %v138_v10 = vpop.f32.mrb[0].mxu0 }
 0x13b   :  { %v144_v11 = vrot.slane %v138_v10, 4  ;;  %v215_v12 = vpop.f32.mrb[1].mxu0 }
 0x13c   :  { %v141_v13 = vpop.f32.mrb[2].mxu0 }
 0x13d   :  { %v145_v14 = vmax.f32 %v138_v10, %v144_v11  ;;  %v216_v15 = vpop.f32.mrb[3].mxu0 }
 0x13f   :  { %v146_v16 = vrot.slane %v145_v14, 2 }
 0x141   :  { %v147_v17 = vmax.f32 %v145_v14, %v146_v16 }
 0x143   :  { %v148_v18 = vrot.slane %v147_v17, 1 }
 0x145   :  { %v149_v19 = vmax.f32 %v147_v17, %v148_v18 }
 0x147   :  { %v150_v20 = vsub.f32 %v138_v10, %v149_v19 }
 0x149   :  { %v151_v21 = vmul.f32 1.442695, %v150_v20 }
 0x14b   :  { %232 = vpow2.f32 %v151_v21 }
 0x155   :  { %v233_v22 = vpop.eup %232 }
 0x156   :  { %v153_v23 = vrot.slane %v233_v22, 4 }
 0x158   :  { %v154_v24 = vadd.f32 %v233_v22, %v153_v23 }
 0x15a   :  { %v155_v25 = vrot.slane %v154_v24, 2 }
 0x15c   :  { %v156_v26 = vadd.f32 %v155_v25, %v154_v24 }
 0x15e   :  { %v157_v27 = vrot.slane %v156_v26, 1 }
 0x160   :  { %v158_v28 = vadd.f32 %v157_v27, %v156_v26 }
 0x162   :  { %234 = vlog2.f32 %v158_v28 }
 0x16c   :  { %v235_v29 = vpop.eup %234 }
 0x16d   :  { %v160_v30 = vmul.f32 0.6931472, %v235_v29 }
 0x16f   :  { %v161_v31 = vadd.f32 %v160_v30, %v149_v19 }
 0x171   :  { %v162_v32 = vsub.f32 %v138_v10, %v161_v31 }
 0x173   :  { %163 = vst [vmem:[#allocation7] sm:$0xff] %v162_v32 }
 0x174   :  { %291 = shalt.err (!%p288_p6)
}
 0x175   :  { %s292_s10 = scalar_lea.hbm %s375_s2, 128 }
 0x176   :  { %p293_p7 = scmp.ne.s32.totalorder %s375_s2, %s292_s10  ;;  %p296_p8 = scmp.lt.u32.totalorder %s292_s10, %s375_s2 }
 0x178   :  { %p298_p9 = pnand %p296_p8, %p293_p7 }
 0x17a   :  { %301 = shalt.err (!%p298_p9)
}
 0x17b   :  { %173 = dma.vmem_to_hbm [thread:$0]  %s171_s6, 128, %s375_s2, [#allocation4]  }
 0x17c   :  { %306 = dma.done.wait [#allocation4], 128  }
 0x17d   :  { %307 = vsyncadd [#allocation4], 4294967168 }
 0x17e   :  { %177 = vsyncpa [#allocation3], 1 }
 0x17f   :  { %178 = vsyncpa [#allocation6], 1 }
 0x180   :  { %179 = vsyncpa [#allocation4], 1 }

</bundles_post_ra>
